<compile_context>
chip_gen: v6e
topology: v6e:2x2x1
jax: 0.10.0
libtpu: 0.0.40
codegen_flags: <defaults>
</compile_context>

<pallas_src>
import functools

import jax
import jax.numpy as jnp
from jax import lax
from jax.experimental import pallas as pl
from jax.experimental.pallas import tpu as pltpu


# --------------------------------------------------------------------------------------
# Kernel
# --------------------------------------------------------------------------------------
def _conf_kernel(x_ref, w1_ref, shift_ref, w23t_ref, b23_ref, out_ref, acc_ref):
    """One (row-tile, 2H-column-slab) grid step; accumulates the slab's logit contribution."""
    j = pl.program_id(1)  # reduction axis over the (padded) 2H dimension (last, 'arbitrary')

    @pl.when(j == 0)
    def _():
        acc_ref[...] = jnp.zeros_like(acc_ref)

    # In-kernel cast of the x tile to the compute dtype (no-op on the f32 path); avoids a separate
    # wrapper-side cast that would re-read/re-write x in HBM.
    x = x_ref[...].astype(w1_ref.dtype)
    # Linear(H -> 2H, bias=False); eval-mode BatchNorm scale is pre-folded into w1's columns.
    h1 = jnp.dot(x, w1_ref[...], preferred_element_type=jnp.float32)
    # BatchNorm shift (running stats) + ReLU, kept in f32.  Dropout(0.1) == identity at inference.
    h1 = jnp.maximum(h1 + shift_ref[...], 0.0)
    # Fused Linear(2H->H) o Linear(H->1) collapses to a (2H,) matvec.  A 1-wide MXU matmul would
    # waste the systolic array, so do it on the VPU (multiply) + XLU (lane reduction) instead.
    acc_ref[...] += jnp.sum(h1 * w23t_ref[...], axis=-1, keepdims=True)

    @pl.when(j == pl.num_programs(1) - 1)
    def _():
        out_ref[...] = jax.nn.sigmoid(acc_ref[...] + b23_ref[0, 0]).astype(out_ref.dtype)


# --------------------------------------------------------------------------------------
# Chip-aware tiling helpers
# --------------------------------------------------------------------------------------
def _round_up(x, m):
    return ((x + m - 1) // m) * m


def _chip_profile():
    """Generation-aware tiling profile (queried once, at fold time)."""
    kind = ""
    try:
        kind = jax.devices()[0].device_kind.lower()
    except Exception:
        pass
    vmem_cap = None
    try:
        vmem_cap = int(pltpu.get_tpu_info().vmem_capacity_bytes)
    except Exception:
        pass

    is_v7 = ("v7" in kind) or (vmem_cap is not None and vmem_cap <= (64 << 20))
    is_v6 = "v6" in kind

    if is_v7:
        # 64 MiB physical VMEM, 2 TensorCores: keep tm=512 (already compute-bound), modest col
        # tile so double-buffered x + W1 slabs stay well under budget, and leave compiler headroom.
        return dict(tm_cap=512, col_cap=1024, vmem_clamp=48 << 20, split_rows=True)
    if is_v6:
        # 128 MiB VMEM, ~1.4 TB/s HBM vs 918 TF/s MXU: larger row tile escapes the W1-DMA-bound
        # regime; allow ~104 MiB scoped VMEM.
        return dict(tm_cap=1024, col_cap=2048, vmem_clamp=104 << 20, split_rows=False)
    # v5e / unknown: compute-bound already at small tiles; keep things small and simple.
    return dict(tm_cap=512, col_cap=2048, vmem_clamp=100 << 20, split_rows=False)


def _choose_tm(n_rows, *, tm_cap, split_rows):
    """Row tile: as large as reasonable for MXU/DMA efficiency.  On v7x only, keep >=2 row steps
    so the 'parallel' row axis can shard across the 2 TensorCores."""
    tm = n_rows if n_rows <= tm_cap else tm_cap
    if split_rows and n_rows >= 256 and pl.cdiv(n_rows, tm) < 2:
        tm = _round_up(pl.cdiv(n_rows, 2), 128)
    return int(tm)


def _choose_col_tile(h2, cap):
    """Column tile over the 2H dimension (multiple of 128 unless it's the full dim).  The weights
    are zero-padded up to a multiple of this tile, so any choice is exact."""
    if h2 <= cap:
        return int(h2)
    return int(cap)


def _vmem_limit_bytes(tm, h, col_tile, x_dtype, compute_dtype, clamp):
    def pad(v, m):
        return ((v + m - 1) // m) * m

    x_b = tm * pad(h, 128) * jnp.dtype(x_dtype).itemsize
    w1_b = pad(h, 8) * pad(col_tile, 128) * jnp.dtype(compute_dtype).itemsize
    sh_b = 8 * pad(col_tile, 128) * 4
    w23_b = 8 * pad(col_tile, 128) * 4
    out_b = tm * 128 * 4
    acc_b = tm * 128 * 4
    need = 2 * (x_b + w1_b + sh_b + w23_b + out_b) + acc_b  # double-buffered pipeline
    return int(min(max(need + need // 2, 32 << 20), clamp))


# --------------------------------------------------------------------------------------
# One-time parameter folding (call at weight-load time, NOT per forward)
# --------------------------------------------------------------------------------------
def fold_confidence_params(params, *, compute_dtype=jnp.bfloat16, col_tile=None):
    """Exact inference-time folds: BN scale into W1's columns (shift stays additive),
    Linear(2H->H) o Linear(H->1) into a single (2H,) vector + scalar bias.
    Results are zero-padded on the 2H axis to a multiple of the chosen column tile."""
    H, H2 = params["w1"].shape
    prof = _chip_profile()

    if col_tile is None:
        col_tile = _choose_col_tile(H2, prof["col_cap"])
    else:
        col_tile = int(col_tile)
        assert col_tile >= H2 or col_tile % 128 == 0, "col_tile must be a multiple of 128"

    inv_std = lax.rsqrt(params["bn_var"] + params["bn_eps"])
    scale = params["bn_gamma"] * inv_std                                     # (2H,)
    shift = (params["bn_beta"] - params["bn_mean"] * scale).astype(jnp.float32)  # (2H,)
    w1_f = (params["w1"] * scale[None, :]).astype(compute_dtype)             # (H, 2H)
    w23 = (params["w2"] @ params["w3"]).reshape(H2).astype(jnp.float32)      # (2H,)  fused L2 o L3
    b23 = (params["b2"] @ params["w3"] + params["b3"]).reshape(1, 1).astype(jnp.float32)

    # Zero-pad the reduction (2H) axis up to a multiple of col_tile: padded W1 columns and padded
    # w23 entries are zero, so their contribution to the accumulation is exactly zero.
    H2p = _round_up(H2, col_tile)
    if H2p != H2:
        pad = H2p - H2
        w1_f = jnp.pad(w1_f, ((0, 0), (0, pad)))
        shift = jnp.pad(shift, ((0, pad),))
        w23 = jnp.pad(w23, ((0, pad),))

    return {
        "w1_f": w1_f,                        # (H, H2p)  compute_dtype, BN scale folded
        "shift": shift.reshape(1, H2p),      # (1, H2p)  f32 BN shift
        "w23_t": w23.reshape(1, H2p),        # (1, H2p)  f32, transposed for the VPU matvec
        "b23": b23,                          # (1, 1)    f32 scalar -> SMEM
        "col_tile": int(col_tile),
        "hidden_size": int(H),
        "profile": prof,
    }


# --------------------------------------------------------------------------------------
# Forward
# --------------------------------------------------------------------------------------
@functools.partial(jax.jit, static_argnames=("tm", "col_tile", "vmem_clamp"))
def _conf_pallas_call(x2d, w1_f, shift, w23_t, b23, *, tm, col_tile, vmem_clamp):
    N, H = x2d.shape
    H2p = w1_f.shape[1]
    grid = (pl.cdiv(N, tm), H2p // col_tile)

    return pl.pallas_call(
        _conf_kernel,
        out_shape=jax.ShapeDtypeStruct((N, 1), jnp.float32),
        grid_spec=pltpu.PrefetchScalarGridSpec(
            num_scalar_prefetch=0,
            grid=grid,
            in_specs=[
                pl.BlockSpec((tm, H), lambda i, j: (i, 0)),            # x row tile (input dtype)
                pl.BlockSpec((H, col_tile), lambda i, j: (0, j)),      # BN-folded W1 column slab
                pl.BlockSpec((1, col_tile), lambda i, j: (0, j)),      # BN shift slice
                pl.BlockSpec((1, col_tile), lambda i, j: (0, j)),      # fused w23 slice (transposed)
                pl.BlockSpec(memory_space=pltpu.MemorySpace.SMEM),     # scalar b23 (1,1) in SMEM
            ],
            out_specs=pl.BlockSpec((tm, 1), lambda i, j: (i, 0)),
            scratch_shapes=[pltpu.VMEM((tm, 1), jnp.float32)],         # logit accumulator
        ),
        compiler_params=pltpu.CompilerParams(
            dimension_semantics=("parallel", "arbitrary"),
            vmem_limit_bytes=_vmem_limit_bytes(tm, H, col_tile, x2d.dtype, w1_f.dtype, vmem_clamp),
        ),
    )(x2d, w1_f, shift, w23_t, b23)


def confidence_model_forward(hidden_states, folded, tm=None):
    """hidden_states: (B, S, H).  folded: output of fold_confidence_params (precomputed once).
    Returns sigmoid confidence scores of shape (B, S, 1)."""
    B, S, H = hidden_states.shape
    assert H == folded["hidden_size"]
    N = B * S
    prof = folded["profile"]
    if tm is None:
        tm = _choose_tm(N, tm_cap=prof["tm_cap"], split_rows=prof["split_rows"])

    x2d = hidden_states.reshape(N, H)   # no dtype cast here; the kernel casts each tile in VMEM
    out = _conf_pallas_call(
        x2d, folded["w1_f"], folded["shift"], folded["w23_t"], folded["b23"],
        tm=int(tm), col_tile=folded["col_tile"], vmem_clamp=int(prof["vmem_clamp"]),
    )
    return out.reshape(B, S, 1)


def gather_confidence(scores, token_indices):
    # Optional token_indices path: torch.gather(scores, 1, idx[..., None]).squeeze(-1)
    # (glue-level gather; sigmoid is monotone so applying it before the gather is equivalent)
    return jnp.take_along_axis(scores, token_indices[..., None], axis=1)[..., 0]


# --------------------------------------------------------------------------------------
# Raw (unfolded) parameters + pure-JAX reference
# --------------------------------------------------------------------------------------
def init_params(key, hidden_size):
    H = hidden_size
    H2 = 2 * H
    ks = jax.random.split(key, 6)
    return {
        "w1": jax.random.normal(ks[0], (H, H2), jnp.float32) * (1.0 / jnp.sqrt(H)),
        "bn_gamma": jnp.ones((H2,), jnp.float32),
        "bn_beta": jnp.zeros((H2,), jnp.float32),
        "bn_mean": jax.random.normal(ks[1], (H2,), jnp.float32) * 0.1,
        "bn_var": jnp.abs(jax.random.normal(ks[2], (H2,), jnp.float32)) + 0.5,
        "bn_eps": jnp.float32(1e-5),
        "w2": jax.random.normal(ks[3], (H2, H), jnp.float32) * (1.0 / jnp.sqrt(H2)),
        "b2": jnp.zeros((H,), jnp.float32),
        "w3": jax.random.normal(ks[4], (H, 1), jnp.float32) * (1.0 / jnp.sqrt(H)),
        "b3": jnp.zeros((1,), jnp.float32),
    }


def _reference(hidden_states, params):
    """Unfused pure-JAX reference matching the PyTorch module (eval mode)."""
    B, S, H = hidden_states.shape
    x = hidden_states.reshape(-1, H)
    h1 = x @ params["w1"]
    inv_std = 1.0 / jnp.sqrt(params["bn_var"] + params["bn_eps"])
    h1 = (h1 - params["bn_mean"]) * inv_std * params["bn_gamma"] + params["bn_beta"]
    h1 = jnp.maximum(h1, 0.0)
    h2 = h1 @ params["w2"] + params["b2"]
    logits = h2 @ params["w3"] + params["b3"]
    return jax.nn.sigmoid(logits).reshape(B, S, 1)


if __name__ == "__main__":
    key = jax.random.PRNGKey(0)
    k_x, k_p = jax.random.split(key)

    B, S, H = 2, 8, 32               # batch, seq, hidden_size
    hidden_states = jax.random.normal(k_x, (B, S, H), jnp.float32)
    params = init_params(k_p, H)

    ref = _reference(hidden_states, params)

    # f32 path: tight check against the unfused reference (fusion only reorders f32 rounding).
    folded_f32 = fold_confidence_params(params, compute_dtype=jnp.float32)
    scores_f32 = jax.block_until_ready(confidence_model_forward(hidden_states, folded_f32))
    assert scores_f32.shape == (B, S, 1)
    assert jnp.allclose(scores_f32, ref, atol=1e-4, rtol=1e-4), "f32 mismatch vs reference"

    # bf16 fast path (default): looser tolerance on the bounded sigmoid output.
    folded_bf16 = fold_confidence_params(params)            # folded ONCE, reused every forward
    scores_bf16 = jax.block_until_ready(confidence_model_forward(hidden_states, folded_bf16))
    assert scores_bf16.shape == (B, S, 1)
    assert jnp.allclose(scores_bf16, ref, atol=2e-2, rtol=2e-2), "bf16 mismatch vs reference"

    # Optional token_indices gather path.
    token_indices = jnp.array([[0, 3, 7], [1, 2, 5]], dtype=jnp.int32)
    conf = gather_confidence(scores_f32, token_indices)
    assert conf.shape == (2, 3)

    # TODO(synk): training-mode BatchNorm (batch statistics) and active Dropout are not modeled.
    print("KERNEL_OK")
</pallas_src>

<mosaic_0001>
module attributes {stable_mosaic.version = 11 : i64} {
  func.func @_conf_kernel(%arg0: i32, %arg1: i32, %arg2: memref<16x32xf32, #tpu.memory_space<vmem>>, %arg3: memref<32x64xf32, #tpu.memory_space<vmem>>, %arg4: memref<1x64xf32, #tpu.memory_space<vmem>>, %arg5: memref<1x64xf32, #tpu.memory_space<vmem>>, %arg6: memref<1x1xf32, #tpu.memory_space<smem>>, %arg7: memref<16x1xf32, #tpu.memory_space<vmem>>, %arg8: memref<16x1xf32, #tpu.memory_space<vmem>>) attributes {dimension_semantics = [#tpu.dimension_semantics<parallel>, #tpu.dimension_semantics<arbitrary>], iteration_bounds = array<i64: 1, 1>, scalar_prefetch = 0 : i64, scratch_operands = 1 : i64, tpu.core_type = #tpu.core_type<tc>, window_params = [{transform_indices = @transform_0, window_bounds = array<i64: 16, 32>}, {transform_indices = @transform_1, window_bounds = array<i64: 32, 64>}, {transform_indices = @transform_2, window_bounds = array<i64: 1, 64>}, {transform_indices = @transform_3, window_bounds = array<i64: 1, 64>}, {transform_indices = @transform_4, window_bounds = array<i64: 1, 1>}, {transform_indices = @transform_5, window_bounds = array<i64: 16, 1>}]} {
    %c0_i32 = arith.constant 0 : i32
    %0 = arith.cmpi eq, %arg1, %c0_i32 : i32
    %1 = arith.extui %0 : i1 to i32
    %c0_i32_0 = arith.constant 0 : i32
    %2 = arith.cmpi ne, %1, %c0_i32_0 : i32
    scf.if %2 {
      %cst_16 = arith.constant 0.000000e+00 : f32
      %22 = vector.broadcast %cst_16 : f32 to vector<16x1xf32>
      %c0_17 = arith.constant 0 : index
      %c0_18 = arith.constant 0 : index
      %23 = vector.load %arg8[%c0_17, %c0_18] : memref<16x1xf32, #tpu.memory_space<vmem>>, vector<16x1xf32>
      tpu.vector_store %arg8[%c0_17, %c0_18], %22 {strides = array<i32>} : memref<16x1xf32, #tpu.memory_space<vmem>>, vector<16x1xf32>,
    } else {
    }
    %c0 = arith.constant 0 : index
    %c0_1 = arith.constant 0 : index
    %3 = vector.load %arg2[%c0, %c0_1] : memref<16x32xf32, #tpu.memory_space<vmem>>, vector<16x32xf32>
    %c0_2 = arith.constant 0 : index
    %c0_3 = arith.constant 0 : index
    %4 = vector.load %arg3[%c0_2, %c0_3] : memref<32x64xf32, #tpu.memory_space<vmem>>, vector<32x64xf32>
    %cst = arith.constant dense<0.000000e+00> : vector<16x64xf32>
    %5 = tpu.matmul %3, %4, %cst {dimension_numbers = #tpu.dot_dimension_numbers<[1], [0], [0], [1], [0, 0, 1, 1], [], []>} : vector<16x32xf32>, vector<32x64xf32>, vector<16x64xf32> -> vector<16x64xf32>
    %c0_4 = arith.constant 0 : index
    %c0_5 = arith.constant 0 : index
    %6 = vector.load %arg4[%c0_4, %c0_5] : memref<1x64xf32, #tpu.memory_space<vmem>>, vector<1x64xf32>
    %7 = vector.broadcast %6 : vector<1x64xf32> to vector<16x64xf32>
    %8 = arith.addf %5, %7 : vector<16x64xf32>
    %cst_6 = arith.constant 0.000000e+00 : f32
    %9 = vector.broadcast %cst_6 : f32 to vector<16x64xf32>
    %10 = arith.maximumf %8, %9 : vector<16x64xf32>
    %c0_7 = arith.constant 0 : index
    %c0_8 = arith.constant 0 : index
    %11 = vector.load %arg8[%c0_7, %c0_8] : memref<16x1xf32, #tpu.memory_space<vmem>>, vector<16x1xf32>
    %c0_9 = arith.constant 0 : index
    %c0_10 = arith.constant 0 : index
    %12 = vector.load %arg5[%c0_9, %c0_10] : memref<1x64xf32, #tpu.memory_space<vmem>>, vector<1x64xf32>
    %13 = vector.broadcast %12 : vector<1x64xf32> to vector<16x64xf32>
    %14 = arith.mulf %10, %13 : vector<16x64xf32>
    %cst_11 = arith.constant dense<0.000000e+00> : vector<16xf32>
    %15 = vector.multi_reduction <add>, %14, %cst_11 [1] : vector<16x64xf32> to vector<16xf32>
    %16 = vector.shape_cast %15 : vector<16xf32> to vector<16x1xf32>
    %17 = arith.addf %11, %16 : vector<16x1xf32>
    %c0_12 = arith.constant 0 : index
    %c0_13 = arith.constant 0 : index
    %18 = vector.load %arg8[%c0_12, %c0_13] : memref<16x1xf32, #tpu.memory_space<vmem>>, vector<16x1xf32>
    tpu.vector_store %arg8[%c0_12, %c0_13], %17 {strides = array<i32>} : memref<16x1xf32, #tpu.memory_space<vmem>>, vector<16x1xf32>,
    %c0_i32_14 = arith.constant 0 : i32
    %19 = arith.cmpi eq, %arg1, %c0_i32_14 : i32
    %20 = arith.extui %19 : i1 to i32
    %c0_i32_15 = arith.constant 0 : i32
    %21 = arith.cmpi ne, %20, %c0_i32_15 : i32
    scf.if %21 {
      %c0_16 = arith.constant 0 : index
      %c0_17 = arith.constant 0 : index
      %22 = vector.load %arg8[%c0_16, %c0_17] : memref<16x1xf32, #tpu.memory_space<vmem>>, vector<16x1xf32>
      %c0_18 = arith.constant 0 : index
      %c0_19 = arith.constant 0 : index
      %23 = memref.load %arg6[%c0_18, %c0_19] : memref<1x1xf32, #tpu.memory_space<smem>>
      %24 = vector.broadcast %23 : f32 to vector<16x1xf32>
      %25 = arith.addf %22, %24 : vector<16x1xf32>
      %26 = arith.negf %25 : vector<16x1xf32>
      %27 = math.exp %26 : vector<16x1xf32>
      %cst_20 = arith.constant 1.000000e+00 : f32
      %28 = vector.broadcast %cst_20 : f32 to vector<16x1xf32>
      %29 = arith.addf %28, %27 : vector<16x1xf32>
      %30 = arith.divf %28, %29 : vector<16x1xf32>
      %c0_21 = arith.constant 0 : index
      %c0_22 = arith.constant 0 : index
      %31 = vector.load %arg7[%c0_21, %c0_22] : memref<16x1xf32, #tpu.memory_space<vmem>>, vector<16x1xf32>
      tpu.vector_store %arg7[%c0_21, %c0_22], %30 {strides = array<i32>} : memref<16x1xf32, #tpu.memory_space<vmem>>, vector<16x1xf32>,
    } else {
    }
    return
  }
  func.func @transform_0(%arg0: i32, %arg1: i32) -> (i32, i32) {
    %c0_i32 = arith.constant 0 : i32
    %c0_i32_0 = arith.constant 0 : i32
    return %arg0, %c0_i32 : i32, i32
  }
  func.func @transform_1(%arg0: i32, %arg1: i32) -> (i32, i32) {
    %c0_i32 = arith.constant 0 : i32
    %c0_i32_0 = arith.constant 0 : i32
    return %c0_i32, %arg1 : i32, i32
  }
  func.func @transform_2(%arg0: i32, %arg1: i32) -> (i32, i32) {
    %c0_i32 = arith.constant 0 : i32
    %c0_i32_0 = arith.constant 0 : i32
    return %c0_i32, %arg1 : i32, i32
  }
  func.func @transform_3(%arg0: i32, %arg1: i32) -> (i32, i32) {
    %c0_i32 = arith.constant 0 : i32
    %c0_i32_0 = arith.constant 0 : i32
    return %c0_i32, %arg1 : i32, i32
  }
  func.func @transform_4(%arg0: i32, %arg1: i32) -> (i32, i32) {
    %c0_i32 = arith.constant 0 : i32
    %c0_i32_0 = arith.constant 0 : i32
    %c0_i32_1 = arith.constant 0 : i32
    return %c0_i32, %c0_i32_0 : i32, i32
  }
  func.func @transform_5(%arg0: i32, %arg1: i32) -> (i32, i32) {
    %c0_i32 = arith.constant 0 : i32
    %c0_i32_0 = arith.constant 0 : i32
    return %arg0, %c0_i32 : i32, i32
  }
}

</mosaic_0001>

<bundles_post_ra>
// kernel: _conf_pallas_call.1
= control target key start
LH: loop header
LB: loop body
LE: loop exit
PB: predicated region body
PF: predicated region fallthrough
CT: control target
= control target key end

     0   :  { %11 = vsyncpa [#allocation5], 0  ;;  %s349_s0 = inlined_call_operand.hbm [shape: f32[16,32], index: 0, kind: input, shape index: {}]   ;;  %s350_s1 = inlined_call_operand.hbm [shape: f32[32,64], index: 1, kind: input, shape index: {}]   ;;  %s351_s2 = inlined_call_operand.vmem [shape: f32[1,64], index: 2, kind: input, shape index: {}]   ;;  %s352_s3 = inlined_call_operand.vmem [shape: f32[1,64], index: 3, kind: input, shape index: {}]   ;;  %s353_s4 = inlined_call_operand.<no memory space> [shape: f32[1,1], index: 4, kind: input, shape index: {}]   ;;  %s354_s5 = inlined_call_operand.vmem [shape: f32[16,1], index: 5, kind: output, shape index: {}]  }
   0x1   :  { %12 = vsyncpa [#allocation7], 0  ;;  %s285_s18 = smov [#allocation4]  }
   0x2   :  { %s18_s19 = sshll.u32 %s285_s18, 4  ;;  %s19_s19 = int_to_ptr.vmem [resolvable:$true] %s18_s19 }
   0x3   :  { %s249_s20 = scalar_lea.vmem %s19_s19, 256  ;;  %p254_p1 = scmp.lt.s32.totalorder %s19_s19, %s19_s19 }
   0x4   :  { %p250_p0 = scmp.ne.s32.totalorder %s19_s19, %s249_s20  ;;  %p255_p2 = scmp.lt.s32.totalorder %s249_s20, %s249_s20 }
   0x6   :  { %p256_p3 = por %p255_p2, %p254_p1 }
   0x8   :  { %p257_p4 = pnand %p256_p3, %p250_p0 }
   0xa   :  { %260 = shalt.err (!%p257_p4)
}
   0xb   :  { %s286_s21 = smov 128   ;;  %s287_s22 = smov 8  }
   0xc   :  { %24 = dma.hbm_to_vmem [thread:$0]  %s349_s0, 256, %s19_s19, [#allocation5], %s286_s21, %s286_s21, %s287_s22  }
   0xd   :  { %s288_s25 = smov [#allocation6]  }
   0xe   :  { %s30_s26 = sshll.u32 %s288_s25, 4  ;;  %s31_s26 = int_to_ptr.vmem [resolvable:$true] %s30_s26 }
   0xf   :  { %s269_s27 = scalar_lea.vmem %s31_s26, 512  ;;  %p274_p6 = scmp.lt.s32.totalorder %s31_s26, %s31_s26 }
  0x10   :  { %p270_p5 = scmp.ne.s32.totalorder %s31_s26, %s269_s27  ;;  %p275_p7 = scmp.lt.s32.totalorder %s269_s27, %s269_s27 }
  0x12   :  { %p276_p8 = por %p275_p7, %p274_p6 }
  0x14   :  { %p277_p9 = pnand %p276_p8, %p270_p5 }
  0x16   :  { %280 = shalt.err (!%p277_p9)
}
  0x17   :  { %36 = dma.hbm_to_vmem [thread:$0]  %s350_s1, 512, %s31_s26, [#allocation7], %s286_s21, %s286_s21, %s287_s22  }
  0x18   :  { %281 = dma.done.wait [#allocation5], 256  }
  0x19   :  { %282 = vsyncadd [#allocation5], 4294967040 }
  0x1a   :  { %283 = dma.done.wait [#allocation7], 512  }
  0x1b   :  { %284 = vsyncadd [#allocation7], 4294966784  ;;  %vm69_vm0 = vcmask 261120   ;;  %v61_v0 = vld [vmem:[#allocation6 + $0x18] sm:$0xff]  ;;  %v60_v1 = vld [vmem:[#allocation6 + $0x10] sm:$0xff]  ;;  %vm53_vm1 = vcmask 7168   ;;  %v182_v25 = vstv %s353_s4 }
  0x1c   :  { %217 = vmatprep.subr.mxu0 %v61_v0  ;;  %v56_v2 = vld [vmem:[#allocation4] sm:$0xff]  ;;  %v59_v3 = vld [vmem:[#allocation6 + $0x8] sm:$0xff]  ;;  %v58_v4 = vld [vmem:[#allocation6] sm:$0xff]  ;;  %v289_v6 = vmov 0.0   ;;  %vm164_vm2 = vcmask 523264  }
  0x1d   :  { %218 = vmatpush3.msra.mxu0 %v61_v0  ;;  %225 = vmatprep.mubr.msk.f32.mxu0 %vm69_vm0, %v56_v2  ;;  %v57_v5 = vld [vmem:[#allocation4 + $0x8] sm:$0xff]  ;;  %54 = vst.msk [vmem:[#allocation2] sm:$0xff] %vm53_vm1, %v289_v6  ;;  %55 = vst.msk [vmem:[#allocation2 + $0x8] sm:$0xff] %vm53_vm1, %v289_v6  ;;  %v205_v7 = vld [vmem:[%s351_s2] ss:$0 sm:$0xff] }
  0x1e   :  { %219 = vmatprep.subr.mxu0 %v60_v1  ;;  %v208_v14 = vld [vmem:[%s352_s3] ss:$0 sm:$0xff] }
  0x1f   :  { %220 = vmatpush3.msra.mxu0 %v60_v1 }
  0x20   :  { %221 = vmatprep.subr.mxu0 %v59_v3 }
  0x21   :  { %222 = vmatpush3.msra.mxu0 %v59_v3 }
  0x22   :  { %223 = vmatprep.subr.mxu0 %v58_v4 }
  0x23   :  { %224 = vmatpush3.msra.mxu0 %v58_v4 }
  0x24   :  { %226 = vmatmul.mubr.msk.f32.vlgmr.msra.gmra.mxu0 %vm69_vm0, %v57_v5  ;;  %v153_v19 = vld [vmem:[#allocation2] sm:$0xff]  ;;  %v154_v22 = vld [vmem:[#allocation2 + $0x8] sm:$0xff] }
  0xe4   :  { %v227_v8 = vpop.f32.mrf.mxu0 }
  0xe5   :  { %v148_v9 = vadd.f32 %v227_v8, %v205_v7 }
  0xe6   :  { %v142_v10 = vpop.f32.mrf.mxu0 }
  0xe7   :  { %v143_v11 = vadd.f32 %v205_v7, %v142_v10  ;;  %v152_v12 = vmax.f32 %v148_v9, 0.0 }
  0xe9   :  { %v151_v13 = vmax.f32 %v143_v11, 0.0  ;;  %v163_v17 = vmul.f32 %v208_v14, %v152_v12 }
  0xeb   :  { %v162_v15 = vmul.f32 %v208_v14, %v151_v13  ;;  %v168_v18 = vsel %vm164_vm2, %v163_v17, 0.0 }
  0xed   :  { %v165_v16 = vsel %vm164_vm2, %v162_v15, 0.0 }
  0xee   :  { %166 = vadd.xlane.f32.xlu0 %v165_v16 }
  0xf2   :  { %169 = vadd.xlane.f32.xlu0 %v168_v18 }
 0x177   :  { %v167_v20 = vpop.xlane.xlu0 %166 }
 0x178   :  { %v171_v21 = vadd.f32 %v167_v20, %v153_v19 }
 0x17a   :  { %174 = vst.msk [vmem:[#allocation2] sm:$0xff] %vm53_vm1, %v171_v21 }
 0x17b   :  { %v170_v23 = vpop.xlane.xlu0 %169 }
 0x17c   :  { %v172_v24 = vadd.f32 %v170_v23, %v154_v22 }
 0x17e   :  { %175 = vst.msk [vmem:[#allocation2 + $0x8] sm:$0xff] %vm53_vm1, %v172_v24 }
 0x181   :  { %v179_v26 = vld [vmem:[#allocation2] sm:$0xff] }
 0x182   :  { %v183_v27 = vadd.f32 %v182_v25, %v179_v26 }
 0x184   :  { %v209_v28 = vmul.f32 -1.442695, %v183_v27 }
 0x185   :  { %v180_v29 = vld [vmem:[#allocation2 + $0x8] sm:$0xff] }
 0x186   :  { %233 = vpow2.f32 %v209_v28  ;;  %v184_v30 = vadd.f32 %v182_v25, %v180_v29 }
 0x188   :  { %v210_v31 = vmul.f32 -1.442695, %v184_v30 }
 0x18a   :  { %235 = vpow2.f32 %v210_v31 }
 0x193   :  { %v234_v32 = vpop.eup %233 }
 0x194   :  { %v191_v33 = vadd.f32 1.0, %v234_v32 }
 0x196   :  { %237 = vrcp.f32 %v191_v33 }
 0x197   :  { %v236_v34 = vpop.eup %235 }
 0x198   :  { %v192_v35 = vadd.f32 1.0, %v236_v34 }
 0x19a   :  { %239 = vrcp.f32 %v192_v35 }
 0x1a3   :  { %v238_v36 = vpop.eup %237 }
 0x1a4   :  { %197 = vst.msk [vmem:[%s354_s5] sm:$0xff] %vm53_vm1, %v238_v36 }
 0x1a7   :  { %v240_v37 = vpop.eup %239 }
 0x1a8   :  { %198 = vst.msk [vmem:[%s354_s5 + $0x8] sm:$0xff] %vm53_vm1, %v240_v37 }
 0x1a9   :  { %203 = vsyncpa [#allocation5], 1 }
 0x1aa   :  { %204 = vsyncpa [#allocation7], 1 }

</bundles_post_ra>
